<compile_context>
chip_gen: v7x
topology: tpu7x:2x2x1
jax: 0.10.0
libtpu: 0.0.40
codegen_flags: <defaults>
</compile_context>

<pallas_src>
import functools

import jax
import jax.numpy as jnp
from jax.experimental import pallas as pl
from jax.experimental.pallas import tpu as pltpu


# ----------------------------------------------------------------------------
# Fused Pallas kernel
# ----------------------------------------------------------------------------
def _basic_block_kernel(xph_ref, w1_ref, w2_ref, bn1_ref, bn2_ref, *rest,
                        K, S, B, Lout, pad2, has_ds, eps, slope):
    """Everything stays in VMEM / vregs.  GEMM-column layout: column = l*B + b
    (length-major, batch-minor), so the batch fills the MXU N dimension and
    each conv is a single 2-D bf16 matmul with f32 accumulation."""
    if has_ds:
        wd_ref, bnd_ref, out_ref, win1_ref, win2_ref = rest
    else:
        sc_ref, out_ref, win1_ref, win2_ref = rest

    Cin = xph_ref.shape[1]
    Cout = out_ref.shape[0]
    Lpe = Lout + 2 * pad2          # extended conv1/downsample output columns
    Ne = Lpe * B                   # extended GEMM width
    No = Lout * B                  # real GEMM width (= BN sample count N*L)
    inv_n = 1.0 / No

    def leaky(t):
        return jnp.where(t >= 0, t, slope * t)

    def bn_train(t, gb_ref, mask=None):
        # Training-mode BatchNorm1d, single-pass biased stats over (N, L),
        # accumulated in f32: var = E[x^2] - mean^2.
        tm = t if mask is None else jnp.where(mask, t, 0.0)
        mean = jnp.sum(tm, axis=1, keepdims=True) * inv_n
        var = jnp.sum(tm * tm, axis=1, keepdims=True) * inv_n - mean * mean
        return (t - mean) * jax.lax.rsqrt(var + eps) * gb_ref[0] + gb_ref[1]

    # ---- conv1 / downsample im2col window: K contiguous bf16 tap slices ----
    for k in range(K):
        start = (k // S) * B
        win1_ref[k * Cin:(k + 1) * Cin, :] = xph_ref[k % S, :, start:start + Ne]

    # Valid extended columns l in [pad2, pad2+Lout)  <=>  col in [pad2*B, (pad2+Lout)*B).
    col = jax.lax.broadcasted_iota(jnp.int32, (1, Ne), 1)
    valid = jnp.logical_and(col >= pad2 * B, col < (pad2 + Lout) * B)

    win1 = win1_ref[...]

    # ---- conv1 -> bn1 -> LeakyReLU (conv bias elided: cancelled by BN) ----
    h1 = jnp.dot(w1_ref[...], win1, preferred_element_type=jnp.float32)   # (Cout, Ne)
    # y1 already carries conv2's zero padding in its first/last pad2*B columns.
    y1 = jnp.where(valid, leaky(bn_train(h1, bn1_ref, valid)),
                   0.0).astype(jnp.bfloat16)

    # ---- shortcut: downsample conv -> bn (shares win1), or identity f32 x ----
    if has_ds:
        hd = jnp.dot(wd_ref[...], win1, preferred_element_type=jnp.float32)
        sc = bn_train(hd, bnd_ref, valid)[:, pad2 * B:(pad2 + Lout) * B]
    else:
        sc = sc_ref[...]                                                  # (Cout, No) f32

    # ---- conv2 im2col window from the padded bf16 activation ----
    # TODO(synk): on v7x with large Cout, replace this K-x materialized window
    # with K accumulated matmuls over shifted views of y1 to save VMEM.
    for k in range(K):
        win2_ref[k * Cout:(k + 1) * Cout, :] = y1[:, k * B:k * B + No]

    # ---- conv2 -> bn2 -> +shortcut -> LeakyReLU ----
    z = bn_train(jnp.dot(w2_ref[...], win2_ref[...],
                         preferred_element_type=jnp.float32), bn2_ref)
    out_ref[...] = leaky(z + sc)


# ----------------------------------------------------------------------------
# Wrapper
# ----------------------------------------------------------------------------
def basic_block_forward(x_ncl, p, K, stride, padding):
    """x_ncl: (B, Cin, L) float32 in PyTorch NCL layout.  `padding` is the
    module's `first_dilation` argument (conv1/downsample padding)."""
    B, Cin, L = x_ncl.shape
    Cout = p["w1"].shape[0]
    has_ds = (stride != 1) or (Cin != Cout)
    S = stride
    pad2 = K // 2
    Lp1 = L + 2 * padding
    Lout = (Lp1 - K) // stride + 1
    Lpe = Lout + 2 * pad2                       # extended conv1 GEMM columns
    Lphe = (K - 1) // S + Lpe                   # per-phase columns read in-kernel

    # TODO(synk): this pad + phase-split + transpose pass writes an extra copy
    # of x through HBM; at production sizes fold it into a gridded in_spec
    # index_map or an in-kernel DMA from memory_space=pl.ANY.
    x32 = x_ncl.astype(jnp.float32)
    xp = jnp.pad(x32, ((0, 0), (0, 0), (padding, padding)))          # (B, Cin, Lp1)
    phases = []
    for s in range(S):
        ph = jnp.pad(xp[:, :, s::S], ((0, 0), (0, 0), (pad2, 0)))
        short = Lphe - ph.shape[2]
        ph = jnp.pad(ph, ((0, 0), (0, 0), (0, short))) if short > 0 else ph[:, :, :Lphe]
        phases.append(ph)
    xph = jnp.stack(phases, axis=0)                                   # (S, B, Cin, Lphe)
    # GEMM column layout: column index = l*B + b (length-major, batch-minor).
    xph = jnp.transpose(xph, (0, 2, 3, 1)).reshape(S, Cin, Lphe * B)
    xph = xph.astype(jnp.bfloat16)

    def as_gemm_w(w):   # torch (Cout, C, K) -> (Cout, K*C) bf16, k-major columns
        co, ci, k = w.shape
        return jnp.transpose(w, (0, 2, 1)).reshape(co, k * ci).astype(jnp.bfloat16)

    def bn_pair(g, b):
        return jnp.stack([g, b]).reshape(2, g.shape[0], 1).astype(jnp.float32)

    # NOTE: conv biases (b1/b2/bd) are intentionally not passed — a bias feeding
    # a training-mode BatchNorm is exactly cancelled by the mean subtraction.
    args = [xph, as_gemm_w(p["w1"]), as_gemm_w(p["w2"]),
            bn_pair(p["g1"], p["be1"]), bn_pair(p["g2"], p["be2"])]
    if has_ds:
        args += [as_gemm_w(p["wd"]), bn_pair(p["gd"], p["bed"])]
    else:
        assert L == Lout and Cin == Cout, "identity shortcut requires matching shapes"
        # Identity shortcut fed as the original f32 x (no bf16 rounding).
        args.append(jnp.transpose(x32, (1, 2, 0)).reshape(Cin, L * B))

    kern = functools.partial(_basic_block_kernel, K=K, S=S, B=B, Lout=Lout,
                             pad2=pad2, has_ds=has_ds, eps=1e-5, slope=0.01)

    out_cols = pl.pallas_call(
        kern,
        out_shape=jax.ShapeDtypeStruct((Cout, Lout * B), jnp.float32),
        scratch_shapes=[
            pltpu.VMEM((K * Cin, Lpe * B), jnp.bfloat16),    # conv1/downsample window
            pltpu.VMEM((K * Cout, Lout * B), jnp.bfloat16),  # conv2 window
        ],
        # 32 MiB is v7x-safe; TODO(synk): size per generation at production shapes.
        compiler_params=pltpu.CompilerParams(vmem_limit_bytes=32 * 1024 * 1024),
    )(*args)

    # Un-fold the lane-packed (Cout, Lout*B) output back to PyTorch NCL layout.
    return jnp.transpose(out_cols.reshape(Cout, Lout, B), (2, 0, 1))


# ----------------------------------------------------------------------------
# Pure-JAX reference (full f32, HIGHEST precision) for verification only
# ----------------------------------------------------------------------------
def reference_forward(x, p, K, stride, padding):
    def conv(t, w, b, s, pad):
        o = jax.lax.conv_general_dilated(
            t, w, (s,), [(pad, pad)],
            dimension_numbers=("NCH", "OIH", "NCH"),
            precision=jax.lax.Precision.HIGHEST)
        return o + b[None, :, None]

    def bn(t, g, be, eps=1e-5):
        mean = jnp.mean(t, axis=(0, 2), keepdims=True)
        var = jnp.mean((t - mean) ** 2, axis=(0, 2), keepdims=True)
        return (t - mean) * jax.lax.rsqrt(var + eps) * g[None, :, None] + be[None, :, None]

    lrelu = lambda t: jnp.where(t >= 0, t, 0.01 * t)
    B, Cin, L = x.shape
    Cout = p["w1"].shape[0]
    y = lrelu(bn(conv(x, p["w1"], p["b1"], stride, padding), p["g1"], p["be1"]))
    z = bn(conv(y, p["w2"], p["b2"], 1, K // 2), p["g2"], p["be2"])
    if stride != 1 or Cin != Cout:
        sc = bn(conv(x, p["wd"], p["bd"], stride, padding), p["gd"], p["bed"])
    else:
        sc = x
    return lrelu(z + sc)


def make_params(key, Cin, Cout, K):
    ks = jax.random.split(key, 12)

    def n(k, shape, s=0.2):
        return s * jax.random.normal(k, shape, jnp.float32)

    return {
        "w1": n(ks[0], (Cout, Cin, K)), "b1": n(ks[1], (Cout,), 0.1),
        "g1": 1.0 + n(ks[2], (Cout,), 0.1), "be1": n(ks[3], (Cout,), 0.1),
        "w2": n(ks[4], (Cout, Cout, K)), "b2": n(ks[5], (Cout,), 0.1),
        "g2": 1.0 + n(ks[6], (Cout,), 0.1), "be2": n(ks[7], (Cout,), 0.1),
        "wd": n(ks[8], (Cout, Cin, K)), "bd": n(ks[9], (Cout,), 0.1),
        "gd": 1.0 + n(ks[10], (Cout,), 0.1), "bed": n(ks[11], (Cout,), 0.1),
    }


# ----------------------------------------------------------------------------
if __name__ == "__main__":
    root = jax.random.PRNGKey(0)
    configs = [
        # (B, Cin, L, Cout, K, stride, padding)
        (2, 4, 16, 8, 3, 2, 1),   # downsample branch (stride != 1, Cin != Cout)
        (2, 8, 16, 8, 3, 1, 1),   # identity-shortcut branch
    ]
    for cfg_i, (B, Cin, L, Cout, K, stride, padding) in enumerate(configs):
        kp, kx = jax.random.split(jax.random.fold_in(root, cfg_i))
        params = make_params(kp, Cin, Cout, K)
        x = jax.random.normal(kx, (B, Cin, L), jnp.float32)

        out = jax.block_until_ready(
            basic_block_forward(x, params, K, stride, padding))
        ref = jax.block_until_ready(
            reference_forward(x, params, K, stride, padding))

        Lout = (L + 2 * padding - K) // stride + 1
        assert out.shape == ref.shape == (B, Cout, Lout), (out.shape, ref.shape)
        err = float(jnp.max(jnp.abs(out - ref)))
        # MXU runs the bf16 fast path (f32 accumulation); reference is full-f32
        # HIGHEST precision, so allow a few e-2 of drift on BN-scale outputs.
        assert err < 5e-2, err

    print("KERNEL_OK")
</pallas_src>

<mosaic_0001>
module attributes {stable_mosaic.version = 11 : i64} {
  func.func @_basic_block_kernel(%arg0: memref<2x4x22xbf16, #tpu.memory_space<vmem>>, %arg1: memref<8x12xbf16, #tpu.memory_space<vmem>>, %arg2: memref<8x24xbf16, #tpu.memory_space<vmem>>, %arg3: memref<2x8x1xf32, #tpu.memory_space<vmem>>, %arg4: memref<2x8x1xf32, #tpu.memory_space<vmem>>, %arg5: memref<8x12xbf16, #tpu.memory_space<vmem>>, %arg6: memref<2x8x1xf32, #tpu.memory_space<vmem>>, %arg7: memref<8x16xf32, #tpu.memory_space<vmem>>, %arg8: memref<12x20xbf16, #tpu.memory_space<vmem>>, %arg9: memref<24x16xbf16, #tpu.memory_space<vmem>>) attributes {dimension_semantics = [], scalar_prefetch = 0 : i64, scratch_operands = 2 : i64, tpu.core_type = #tpu.core_type<tc>} {
    %c0 = arith.constant 0 : index
    %c0_0 = arith.constant 0 : index
    %c0_1 = arith.constant 0 : index
    %0 = vector.load %arg0[%c0, %c0_0, %c0_1] : memref<2x4x22xbf16, #tpu.memory_space<vmem>>, vector<1x4x20xbf16>
    %1 = vector.shape_cast %0 : vector<1x4x20xbf16> to vector<4x20xbf16>
    %c0_2 = arith.constant 0 : index
    %c0_3 = arith.constant 0 : index
    %2 = vector.load %arg8[%c0_2, %c0_3] : memref<12x20xbf16, #tpu.memory_space<vmem>>, vector<4x20xbf16>
    tpu.vector_store %arg8[%c0_2, %c0_3], %1 {strides = array<i32>} : memref<12x20xbf16, #tpu.memory_space<vmem>>, vector<4x20xbf16>,
    %c1 = arith.constant 1 : index
    %c0_4 = arith.constant 0 : index
    %c0_5 = arith.constant 0 : index
    %3 = vector.load %arg0[%c1, %c0_4, %c0_5] : memref<2x4x22xbf16, #tpu.memory_space<vmem>>, vector<1x4x20xbf16>
    %4 = vector.shape_cast %3 : vector<1x4x20xbf16> to vector<4x20xbf16>
    %c4 = arith.constant 4 : index
    %c0_6 = arith.constant 0 : index
    %5 = vector.load %arg8[%c4, %c0_6] : memref<12x20xbf16, #tpu.memory_space<vmem>>, vector<4x20xbf16>
    tpu.vector_store %arg8[%c4, %c0_6], %4 {strides = array<i32>} : memref<12x20xbf16, #tpu.memory_space<vmem>>, vector<4x20xbf16>,
    %c0_7 = arith.constant 0 : index
    %c0_8 = arith.constant 0 : index
    %c2 = arith.constant 2 : index
    %6 = vector.load %arg0[%c0_7, %c0_8, %c2] : memref<2x4x22xbf16, #tpu.memory_space<vmem>>, vector<1x4x20xbf16>
    %7 = vector.shape_cast %6 : vector<1x4x20xbf16> to vector<4x20xbf16>
    %c8 = arith.constant 8 : index
    %c0_9 = arith.constant 0 : index
    %8 = vector.load %arg8[%c8, %c0_9] : memref<12x20xbf16, #tpu.memory_space<vmem>>, vector<4x20xbf16>
    tpu.vector_store %arg8[%c8, %c0_9], %7 {strides = array<i32>} : memref<12x20xbf16, #tpu.memory_space<vmem>>, vector<4x20xbf16>,
    %9 = tpu.iota {dimensions = array<i32: 1>} : vector<1x20xi32>
    %c2_i32 = arith.constant 2 : i32
    %10 = vector.broadcast %c2_i32 : i32 to vector<1x20xi32>
    %11 = arith.cmpi sge, %9, %10 : vector<1x20xi32>
    %c18_i32 = arith.constant 18 : i32
    %12 = vector.broadcast %c18_i32 : i32 to vector<1x20xi32>
    %13 = arith.cmpi slt, %9, %12 : vector<1x20xi32>
    %14 = arith.andi %11, %13 : vector<1x20xi1>
    %c0_10 = arith.constant 0 : index
    %c0_11 = arith.constant 0 : index
    %15 = vector.load %arg8[%c0_10, %c0_11] : memref<12x20xbf16, #tpu.memory_space<vmem>>, vector<12x20xbf16>
    %c0_12 = arith.constant 0 : index
    %c0_13 = arith.constant 0 : index
    %16 = vector.load %arg1[%c0_12, %c0_13] : memref<8x12xbf16, #tpu.memory_space<vmem>>, vector<8x12xbf16>
    %cst = arith.constant dense<0.000000e+00> : vector<8x20xf32>
    %17 = tpu.matmul %16, %15, %cst {dimension_numbers = #tpu.dot_dimension_numbers<[1], [0], [0], [1], [0, 0, 1, 1], [], []>} : vector<8x12xbf16>, vector<12x20xbf16>, vector<8x20xf32> -> vector<8x20xf32>
    %cst_14 = arith.constant 0.000000e+00 : f32
    %18 = vector.shape_cast %14 : vector<1x20xi1> to vector<1x20xi1>
    %19 = vector.broadcast %18 : vector<1x20xi1> to vector<8x20xi1>
    %20 = vector.broadcast %cst_14 : f32 to vector<8x20xf32>
    %21 = arith.select %19, %17, %20 : vector<8x20xi1>, vector<8x20xf32>
    %cst_15 = arith.constant dense<0.000000e+00> : vector<8xf32>
    %22 = vector.multi_reduction <add>, %21, %cst_15 [1] : vector<8x20xf32> to vector<8xf32>
    %23 = vector.shape_cast %22 : vector<8xf32> to vector<8x1xf32>
    %cst_16 = arith.constant 6.250000e-02 : f32
    %24 = vector.broadcast %cst_16 : f32 to vector<8x1xf32>
    %25 = arith.mulf %23, %24 : vector<8x1xf32>
    %26 = arith.mulf %21, %21 : vector<8x20xf32>
    %cst_17 = arith.constant dense<0.000000e+00> : vector<8xf32>
    %27 = vector.multi_reduction <add>, %26, %cst_17 [1] : vector<8x20xf32> to vector<8xf32>
    %28 = vector.shape_cast %27 : vector<8xf32> to vector<8x1xf32>
    %cst_18 = arith.constant 6.250000e-02 : f32
    %29 = vector.broadcast %cst_18 : f32 to vector<8x1xf32>
    %30 = arith.mulf %28, %29 : vector<8x1xf32>
    %31 = arith.mulf %25, %25 : vector<8x1xf32>
    %32 = arith.subf %30, %31 : vector<8x1xf32>
    %33 = vector.broadcast %25 : vector<8x1xf32> to vector<8x20xf32>
    %34 = arith.subf %17, %33 : vector<8x20xf32>
    %cst_19 = arith.constant 9.99999974E-6 : f32
    %35 = vector.broadcast %cst_19 : f32 to vector<8x1xf32>
    %36 = arith.addf %32, %35 : vector<8x1xf32>
    %37 = math.rsqrt %36 : vector<8x1xf32>
    %38 = vector.broadcast %37 : vector<8x1xf32> to vector<8x20xf32>
    %39 = arith.mulf %34, %38 : vector<8x20xf32>
    %c0_20 = arith.constant 0 : index
    %c0_21 = arith.constant 0 : index
    %c0_22 = arith.constant 0 : index
    %40 = vector.load %arg3[%c0_20, %c0_21, %c0_22] : memref<2x8x1xf32, #tpu.memory_space<vmem>>, vector<1x8x1xf32>
    %41 = vector.shape_cast %40 : vector<1x8x1xf32> to vector<8x1xf32>
    %42 = vector.broadcast %41 : vector<8x1xf32> to vector<8x20xf32>
    %43 = arith.mulf %39, %42 : vector<8x20xf32>
    %c1_23 = arith.constant 1 : index
    %c0_24 = arith.constant 0 : index
    %c0_25 = arith.constant 0 : index
    %44 = vector.load %arg3[%c1_23, %c0_24, %c0_25] : memref<2x8x1xf32, #tpu.memory_space<vmem>>, vector<1x8x1xf32>
    %45 = vector.shape_cast %44 : vector<1x8x1xf32> to vector<8x1xf32>
    %46 = vector.broadcast %45 : vector<8x1xf32> to vector<8x20xf32>
    %47 = arith.addf %43, %46 : vector<8x20xf32>
    %cst_26 = arith.constant 0.000000e+00 : f32
    %48 = vector.broadcast %cst_26 : f32 to vector<8x20xf32>
    %49 = arith.cmpf oge, %47, %48 : vector<8x20xf32>
    %cst_27 = arith.constant 0.00999999977 : f32
    %50 = vector.broadcast %cst_27 : f32 to vector<8x20xf32>
    %51 = arith.mulf %50, %47 : vector<8x20xf32>
    %52 = arith.select %49, %47, %51 : vector<8x20xi1>, vector<8x20xf32>
    %cst_28 = arith.constant 0.000000e+00 : f32
    %53 = vector.shape_cast %14 : vector<1x20xi1> to vector<1x20xi1>
    %54 = vector.broadcast %53 : vector<1x20xi1> to vector<8x20xi1>
    %55 = vector.broadcast %cst_28 : f32 to vector<8x20xf32>
    %56 = arith.select %54, %52, %55 : vector<8x20xi1>, vector<8x20xf32>
    %57 = arith.truncf %56 : vector<8x20xf32> to vector<8x20xbf16>
    %c0_29 = arith.constant 0 : index
    %c0_30 = arith.constant 0 : index
    %58 = vector.load %arg5[%c0_29, %c0_30] : memref<8x12xbf16, #tpu.memory_space<vmem>>, vector<8x12xbf16>
    %cst_31 = arith.constant dense<0.000000e+00> : vector<8x20xf32>
    %59 = tpu.matmul %58, %15, %cst_31 {dimension_numbers = #tpu.dot_dimension_numbers<[1], [0], [0], [1], [0, 0, 1, 1], [], []>} : vector<8x12xbf16>, vector<12x20xbf16>, vector<8x20xf32> -> vector<8x20xf32>
    %cst_32 = arith.constant 0.000000e+00 : f32
    %60 = vector.shape_cast %14 : vector<1x20xi1> to vector<1x20xi1>
    %61 = vector.broadcast %60 : vector<1x20xi1> to vector<8x20xi1>
    %62 = vector.broadcast %cst_32 : f32 to vector<8x20xf32>
    %63 = arith.select %61, %59, %62 : vector<8x20xi1>, vector<8x20xf32>
    %cst_33 = arith.constant dense<0.000000e+00> : vector<8xf32>
    %64 = vector.multi_reduction <add>, %63, %cst_33 [1] : vector<8x20xf32> to vector<8xf32>
    %65 = vector.shape_cast %64 : vector<8xf32> to vector<8x1xf32>
    %cst_34 = arith.constant 6.250000e-02 : f32
    %66 = vector.broadcast %cst_34 : f32 to vector<8x1xf32>
    %67 = arith.mulf %65, %66 : vector<8x1xf32>
    %68 = arith.mulf %63, %63 : vector<8x20xf32>
    %cst_35 = arith.constant dense<0.000000e+00> : vector<8xf32>
    %69 = vector.multi_reduction <add>, %68, %cst_35 [1] : vector<8x20xf32> to vector<8xf32>
    %70 = vector.shape_cast %69 : vector<8xf32> to vector<8x1xf32>
    %cst_36 = arith.constant 6.250000e-02 : f32
    %71 = vector.broadcast %cst_36 : f32 to vector<8x1xf32>
    %72 = arith.mulf %70, %71 : vector<8x1xf32>
    %73 = arith.mulf %67, %67 : vector<8x1xf32>
    %74 = arith.subf %72, %73 : vector<8x1xf32>
    %75 = vector.broadcast %67 : vector<8x1xf32> to vector<8x20xf32>
    %76 = arith.subf %59, %75 : vector<8x20xf32>
    %cst_37 = arith.constant 9.99999974E-6 : f32
    %77 = vector.broadcast %cst_37 : f32 to vector<8x1xf32>
    %78 = arith.addf %74, %77 : vector<8x1xf32>
    %79 = math.rsqrt %78 : vector<8x1xf32>
    %80 = vector.broadcast %79 : vector<8x1xf32> to vector<8x20xf32>
    %81 = arith.mulf %76, %80 : vector<8x20xf32>
    %c0_38 = arith.constant 0 : index
    %c0_39 = arith.constant 0 : index
    %c0_40 = arith.constant 0 : index
    %82 = vector.load %arg6[%c0_38, %c0_39, %c0_40] : memref<2x8x1xf32, #tpu.memory_space<vmem>>, vector<1x8x1xf32>
    %83 = vector.shape_cast %82 : vector<1x8x1xf32> to vector<8x1xf32>
    %84 = vector.broadcast %83 : vector<8x1xf32> to vector<8x20xf32>
    %85 = arith.mulf %81, %84 : vector<8x20xf32>
    %c1_41 = arith.constant 1 : index
    %c0_42 = arith.constant 0 : index
    %c0_43 = arith.constant 0 : index
    %86 = vector.load %arg6[%c1_41, %c0_42, %c0_43] : memref<2x8x1xf32, #tpu.memory_space<vmem>>, vector<1x8x1xf32>
    %87 = vector.shape_cast %86 : vector<1x8x1xf32> to vector<8x1xf32>
    %88 = vector.broadcast %87 : vector<8x1xf32> to vector<8x20xf32>
    %89 = arith.addf %85, %88 : vector<8x20xf32>
    %90 = vector.extract_strided_slice %89 {offsets = [0, 2], sizes = [8, 16], strides = [1, 1]} : vector<8x20xf32> to vector<8x16xf32>
    %91 = vector.extract_strided_slice %57 {offsets = [0, 0], sizes = [8, 16], strides = [1, 1]} : vector<8x20xbf16> to vector<8x16xbf16>
    %c0_44 = arith.constant 0 : index
    %c0_45 = arith.constant 0 : index
    %92 = vector.load %arg9[%c0_44, %c0_45] : memref<24x16xbf16, #tpu.memory_space<vmem>>, vector<8x16xbf16>
    tpu.vector_store %arg9[%c0_44, %c0_45], %91 {strides = array<i32>} : memref<24x16xbf16, #tpu.memory_space<vmem>>, vector<8x16xbf16>,
    %93 = vector.extract_strided_slice %57 {offsets = [0, 2], sizes = [8, 16], strides = [1, 1]} : vector<8x20xbf16> to vector<8x16xbf16>
    %c8_46 = arith.constant 8 : index
    %c0_47 = arith.constant 0 : index
    %94 = vector.load %arg9[%c8_46, %c0_47] : memref<24x16xbf16, #tpu.memory_space<vmem>>, vector<8x16xbf16>
    tpu.vector_store %arg9[%c8_46, %c0_47], %93 {strides = array<i32>} : memref<24x16xbf16, #tpu.memory_space<vmem>>, vector<8x16xbf16>,
    %95 = vector.extract_strided_slice %57 {offsets = [0, 4], sizes = [8, 16], strides = [1, 1]} : vector<8x20xbf16> to vector<8x16xbf16>
    %c16 = arith.constant 16 : index
    %c0_48 = arith.constant 0 : index
    %96 = vector.load %arg9[%c16, %c0_48] : memref<24x16xbf16, #tpu.memory_space<vmem>>, vector<8x16xbf16>
    tpu.vector_store %arg9[%c16, %c0_48], %95 {strides = array<i32>} : memref<24x16xbf16, #tpu.memory_space<vmem>>, vector<8x16xbf16>,
    %c0_49 = arith.constant 0 : index
    %c0_50 = arith.constant 0 : index
    %97 = vector.load %arg2[%c0_49, %c0_50] : memref<8x24xbf16, #tpu.memory_space<vmem>>, vector<8x24xbf16>
    %c0_51 = arith.constant 0 : index
    %c0_52 = arith.constant 0 : index
    %98 = vector.load %arg9[%c0_51, %c0_52] : memref<24x16xbf16, #tpu.memory_space<vmem>>, vector<24x16xbf16>
    %cst_53 = arith.constant dense<0.000000e+00> : vector<8x16xf32>
    %99 = tpu.matmul %97, %98, %cst_53 {dimension_numbers = #tpu.dot_dimension_numbers<[1], [0], [0], [1], [0, 0, 1, 1], [], []>} : vector<8x24xbf16>, vector<24x16xbf16>, vector<8x16xf32> -> vector<8x16xf32>
    %cst_54 = arith.constant dense<0.000000e+00> : vector<8xf32>
    %100 = vector.multi_reduction <add>, %99, %cst_54 [1] : vector<8x16xf32> to vector<8xf32>
    %101 = vector.shape_cast %100 : vector<8xf32> to vector<8x1xf32>
    %cst_55 = arith.constant 6.250000e-02 : f32
    %102 = vector.broadcast %cst_55 : f32 to vector<8x1xf32>
    %103 = arith.mulf %101, %102 : vector<8x1xf32>
    %104 = arith.mulf %99, %99 : vector<8x16xf32>
    %cst_56 = arith.constant dense<0.000000e+00> : vector<8xf32>
    %105 = vector.multi_reduction <add>, %104, %cst_56 [1] : vector<8x16xf32> to vector<8xf32>
    %106 = vector.shape_cast %105 : vector<8xf32> to vector<8x1xf32>
    %cst_57 = arith.constant 6.250000e-02 : f32
    %107 = vector.broadcast %cst_57 : f32 to vector<8x1xf32>
    %108 = arith.mulf %106, %107 : vector<8x1xf32>
    %109 = arith.mulf %103, %103 : vector<8x1xf32>
    %110 = arith.subf %108, %109 : vector<8x1xf32>
    %111 = vector.broadcast %103 : vector<8x1xf32> to vector<8x16xf32>
    %112 = arith.subf %99, %111 : vector<8x16xf32>
    %cst_58 = arith.constant 9.99999974E-6 : f32
    %113 = vector.broadcast %cst_58 : f32 to vector<8x1xf32>
    %114 = arith.addf %110, %113 : vector<8x1xf32>
    %115 = math.rsqrt %114 : vector<8x1xf32>
    %116 = vector.broadcast %115 : vector<8x1xf32> to vector<8x16xf32>
    %117 = arith.mulf %112, %116 : vector<8x16xf32>
    %c0_59 = arith.constant 0 : index
    %c0_60 = arith.constant 0 : index
    %c0_61 = arith.constant 0 : index
    %118 = vector.load %arg4[%c0_59, %c0_60, %c0_61] : memref<2x8x1xf32, #tpu.memory_space<vmem>>, vector<1x8x1xf32>
    %119 = vector.shape_cast %118 : vector<1x8x1xf32> to vector<8x1xf32>
    %120 = vector.broadcast %119 : vector<8x1xf32> to vector<8x16xf32>
    %121 = arith.mulf %117, %120 : vector<8x16xf32>
    %c1_62 = arith.constant 1 : index
    %c0_63 = arith.constant 0 : index
    %c0_64 = arith.constant 0 : index
    %122 = vector.load %arg4[%c1_62, %c0_63, %c0_64] : memref<2x8x1xf32, #tpu.memory_space<vmem>>, vector<1x8x1xf32>
    %123 = vector.shape_cast %122 : vector<1x8x1xf32> to vector<8x1xf32>
    %124 = vector.broadcast %123 : vector<8x1xf32> to vector<8x16xf32>
    %125 = arith.addf %121, %124 : vector<8x16xf32>
    %126 = arith.addf %125, %90 : vector<8x16xf32>
    %cst_65 = arith.constant 0.000000e+00 : f32
    %127 = vector.broadcast %cst_65 : f32 to vector<8x16xf32>
    %128 = arith.cmpf oge, %126, %127 : vector<8x16xf32>
    %cst_66 = arith.constant 0.00999999977 : f32
    %129 = vector.broadcast %cst_66 : f32 to vector<8x16xf32>
    %130 = arith.mulf %129, %126 : vector<8x16xf32>
    %131 = arith.select %128, %126, %130 : vector<8x16xi1>, vector<8x16xf32>
    %c0_67 = arith.constant 0 : index
    %c0_68 = arith.constant 0 : index
    %132 = vector.load %arg7[%c0_67, %c0_68] : memref<8x16xf32, #tpu.memory_space<vmem>>, vector<8x16xf32>
    tpu.vector_store %arg7[%c0_67, %c0_68], %131 {strides = array<i32>} : memref<8x16xf32, #tpu.memory_space<vmem>>, vector<8x16xf32>,
    return
  }
}

</mosaic_0001>

<bundles_post_ra>
// kernel: tpu_custom_call.1
= control target key start
LH: loop header
LB: loop body
LE: loop exit
PB: predicated region body
PF: predicated region fallthrough
CT: control target
= control target key end

     0   :  { %vm29_vm0 = vcmask 156672   ;;  %v38_v1 = vlaneseq  ;;  %s444_s26 = smov 126   ;;  %v445_v3 = vmov 0.0   ;;  %v446_v4 = vmov 1983009808   ;;  %s575_s0 = inlined_call_operand.vmem [shape: bf16[2,4,22], index: 0, kind: input, shape index: {}]   ;;  %s576_s1 = inlined_call_operand.vmem [shape: bf16[8,12], index: 1, kind: input, shape index: {}]   ;;  %s577_s2 = inlined_call_operand.vmem [shape: bf16[8,24], index: 2, kind: input, shape index: {}]   ;;  %s578_s3 = inlined_call_operand.vmem [shape: f32[2,8,1], index: 3, kind: input, shape index: {}]   ;;  %s579_s4 = inlined_call_operand.vmem [shape: f32[2,8,1], index: 4, kind: input, shape index: {}]   ;;  %s580_s5 = inlined_call_operand.vmem [shape: bf16[8,12], index: 5, kind: input, shape index: {}]   ;;  %s581_s6 = inlined_call_operand.vmem [shape: f32[2,8,1], index: 6, kind: input, shape index: {}]   ;;  %s582_s7 = inlined_call_operand.hbm [shape: f32[8,16], index: 7, kind: output, shape index: {}]  }
   0x1   :  { %v362_v0 = vld.sshfl [vmem:[%s575_s0] sm:$0x3 pattern:$0x76325410]  ;;  %381 = vmatprep.subr.bf16.mxu0 %v445_v3  ;;  %387 = vmatprep.subr.bf16.mxu1 %v445_v3  ;;  %v36_v5 = vunpack.c.l.s4 %v446_v4  ;;  %vm447_vm1 = vmmov 0  }
   0x2   :  { %54 = vrot.lane.b32.xlu0 %v362_v0, %s444_s26  ;;  %v28_v2 = vld [vmem:[%s575_s0] sm:$0x3]  ;;  %v39_v6 = vshrl.u32 %v38_v1, 7  ;;  %383 = vmatprep.mubr.msk.bf16.mxu0 %vm447_vm1, %v445_v3 }
   0x3   :  { %30 = vst.msk [vmem:[#allocation2] sm:$0x3] %vm29_vm0, %v28_v2  ;;  %v138_v7 = vld [vmem:[%s578_s3] sm:$0xff]  ;;  %389 = vmatprep.mubr.msk.bf16.mxu1 %vm447_vm1, %v445_v3 }
   0x4   :  { %12 = vsyncpa [#allocation5], 0  ;;  %v410_v8 = vld [vmem:[%s575_s0 + $0x2] ss:$0 sps:$4 sm:$0x33]   ;;  %v37_v9 = vunpack.c.0.s8 %v36_v5  ;;  %v448_v10 = vmov 0  }
   0x5   :  { %408 = vset.pattern.permute.xlu1 %v448_v10  ;;  %409 = vset.pattern.permute.xlu0 %v448_v10  ;;  %vm43_vm2 = vcmask 158722   ;;  %vm75_vm3 = vcmask 1045504   ;;  %v65_v16 = vld [vmem:[%s576_s1] sm:$0xf]  ;;  %vm71_vm4 = vcmask 97280   ;;  %v59_v18 = vand.u32 127, %v38_v1 }
   0x6   :  { %141 = vperm.xlu1 %408, %v138_v7   ;;  %v40_v11 = vsub.s32 %v37_v9, %v39_v6  ;;  %v158_v17 = vld [vmem:[%s580_s5] sm:$0xf]  ;;  %vm122_vm8 = vcmask 162816   ;;  %v365_v28 = vld [vmem:[%s578_s3 + $0x8] sm:$0xff]  ;;  %vm233_vm10 = vcmask 125952   ;;  %s449_s3 = smov 124  }
   0x7   :  { %vm60_vm5 = vcmp.ge.s32.totalorder %v59_v18, 2  ;;  %vm61_vm6 = vcmp.lt.s32.totalorder %v59_v18, 18  ;;  %v218_v36 = vld [vmem:[%s581_s6] sm:$0xff]  ;;  %v367_v56 = vld [vmem:[%s581_s6 + $0x8] sm:$0xff]  ;;  %vm263_vm11 = vcmask 1043456   ;;  %vm259_vm12 = vcmask 195584  }
   0x8   :  { %v41_v12 = vrot.slane %v410_v8, %v40_v11  ;;  %vm521_vm7 = vmand %vm60_vm5, %vm61_vm6  ;;  %v246_v62 = vld [vmem:[%s577_s2] sm:$0xf]  ;;  %vm307_vm13 = vcmask 130048  }
   0x9   :  { %v323_v18 = vld [vmem:[%s579_s4] sm:$0xff] }
   0xa   :  { %44 = vst.msk [vmem:[#allocation2] sm:$0xc] %vm43_vm2, %v41_v12 }
  0x74   :  { %v55_v13 = vpop.permute.xlu0 %54 }
  0x75   :  { %57 = vst.msk [vmem:[#allocation2 + $0x4] sm:$0x3] %vm29_vm0, %v55_v13 }
  0x7c   :  { %v411_v14 = vld [vmem:[#allocation2] sm:$0x3f]  }
  0x7d   :  { %v77_v15 = vsel %vm75_vm3, %v411_v14, 0 }
  0x7e   :  { %382 = vmatpush3.bf16.msra.mxu0 %v77_v15  ;;  %388 = vmatpush3.bf16.msra.mxu1 %v77_v15 }
  0x7f   :  { %393 = vmatprep.subr.bf16.mxu0 %v445_v3 }
  0x81   :  { %384 = vmatmul.mubr.msk.bf16.vlgmr.msra.gmra.mrb[0].mxu0 %vm71_vm4, %v65_v16  ;;  %390 = vmatmul.mubr.msk.bf16.vlgmr.msra.gmra.mrb[0].mxu1 %vm71_vm4, %v158_v17  ;;  %v372_v16 = vld [vmem:[%s579_s4 + $0x8] sm:$0xff]  ;;  %s450_s4 = smov [#allocation4]  }
  0x82   :  { %397 = vmatprep.mubr.msk.bf16.mxu0 %vm447_vm1, %v445_v3  ;;  %s353_s21 = sshll.u32 %s450_s4, 4  ;;  %s354_s21 = int_to_ptr.vmem [resolvable:$true] %s353_s21 }
  0x83   :  { %s420_s22 = scalar_lea.vmem %s354_s21, 128  ;;  %p425_p1 = scmp.lt.s32.totalorder %s354_s21, %s354_s21 }
  0x84   :  { %p421_p0 = scmp.ne.s32.totalorder %s354_s21, %s420_s22  ;;  %p426_p2 = scmp.lt.s32.totalorder %s420_s22, %s420_s22 }
  0x85   :  { %v142_v37 = vpop.permute.xlu1 %141 }
  0x86   :  { %p427_p3 = por %p426_p2, %p425_p1 }
  0x88   :  { %p428_p4 = pnand %p427_p3, %p421_p0 }
 0x154   :  { %v113_v20 = vpop.f32.mrb[0].mxu0  ;;  %v532_v29 = vpop.f32.mrb[0].mxu1 }
 0x155   :  { %v385_v21 = vpop.f32.mrb[1].mxu0  ;;  %v121_v22 = vsel %vm521_vm7, %v113_v20, 0.0  ;;  %v202_v30 = vsel %vm521_vm7, %v532_v29, 0.0  ;;  %v391_v31 = vpop.f32.mrb[1].mxu1 }
 0x156   :  { %v116_v23 = vpop.f32.mrb[2].mxu0  ;;  %v123_v24 = vsel %vm122_vm8, %v121_v22, 0.0  ;;  %v127_v25 = vmul.f32 %v121_v22, %v121_v22  ;;  %v207_v32 = vmul.f32 %v202_v30, %v202_v30  ;;  %v199_v33 = vpop.f32.mrb[2].mxu1  ;;  %v203_v55 = vsel %vm122_vm8, %v202_v30, 0.0 }
 0x157   :  { %124 = vadd.xlane.f32.xlu0 %v123_v24  ;;  %v386_v26 = vpop.f32.mrb[3].mxu0  ;;  %v392_v34 = vpop.f32.mrb[3].mxu1 }
 0x158   :  { %v128_v27 = vsel %vm122_vm8, %v127_v25, 0.0  ;;  %v208_v35 = vsel %vm122_vm8, %v207_v32, 0.0 }
 0x159   :  { %129 = vadd.xlane.f32.xlu1 %v128_v27 }
 0x15b   :  { %209 = vadd.xlane.f32.xlu0 %v208_v35 }
 0x16a   :  { %149 = vperm.xlu1 %408, %v365_v28  }
 0x171   :  { %221 = vperm.xlu0 %409, %v218_v36  }
 0x1e4   :  { %v125_v38 = vpop.xlane.xlu0 %124 }
 0x1e5   :  { %v126_v39 = vmul.f32 0.0625, %v125_v38 }
 0x1e6   :  { %v130_v40 = vpop.xlane.xlu1 %129 }
 0x1e7   :  { %v132_v41 = vmul.f32 %v126_v39, %v126_v39  ;;  %v131_v42 = vmul.f32 0.0625, %v130_v40  ;;  %v134_v45 = vsub.f32 %v113_v20, %v126_v39 }
 0x1e8   :  { %v210_v1 = vpop.xlane.xlu0 %209 }
 0x1e9   :  { %v133_v43 = vsub.f32 %v131_v42, %v132_v41  ;;  %v211_v4 = vmul.f32 0.0625, %v210_v1 }
 0x1ea   :  { %v150_v49 = vpop.permute.xlu1 %149 }
 0x1eb   :  { %v135_v44 = vadd.f32 1e-05, %v133_v43 }
 0x1ed   :  { %414 = vrsqrt.f32 %v135_v44 }
 0x1f0   :  { %v222_v17 = vpop.permute.xlu0 %221 }
 0x1f7   :  { %v415_v46 = vpop.eup %414 }
 0x1f8   :  { %v137_v47 = vmul.f32 %v415_v46, %v134_v45 }
 0x1fa   :  { %v144_v48 = vmul.f32 %v142_v37, %v137_v47 }
 0x1fc   :  { %v152_v50 = vadd.f32 %v150_v49, %v144_v48 }
 0x1fe   :  { %vm153_vm9 = vcmp.ge.f32.partialorder %v152_v50, 0.0  ;;  %v154_v51 = vmul.f32 0.01, %v152_v50 }
 0x200   :  { %v155_v52 = vsel %vm153_vm9, %v152_v50, %v154_v51 }
 0x201   :  { %v156_v53 = vsel %vm521_vm7, %v155_v52, 0.0 }
 0x202   :  { %v157_v54 = vpack.c.bf16 %v156_v53, %v156_v53 }
 0x204   :  { %238 = vrot.lane.b32.xlu1 %v157_v54, %s444_s26  ;;  %234 = vst.msk [vmem:[#allocation3] sm:$0xf] %vm233_vm10, %v157_v54 }
 0x208   :  { %242 = vrot.lane.b32.xlu1 %v157_v54, %s449_s3 }
 0x22c   :  { %204 = vadd.xlane.f32.xlu1 %v203_v55 }
 0x23d   :  { %229 = vperm.xlu1 %408, %v367_v56  }
 0x276   :  { %v239_v57 = vpop.permute.xlu1 %238 }
 0x277   :  { %241 = vst.msk [vmem:[#allocation3 + $0x4] sm:$0xf] %vm233_vm10, %v239_v57 }
 0x27a   :  { %v243_v58 = vpop.permute.xlu1 %242 }
 0x27b   :  { %245 = vst.msk [vmem:[#allocation3 + $0x8] sm:$0xf] %vm233_vm10, %v243_v58 }
 0x27e   :  { %v412_v59 = vld [vmem:[#allocation3] sm:$0xff]  }
 0x27f   :  { %394 = vmatpush3.bf16.msra.mxu0 %v412_v59 }
 0x280   :  { %395 = vmatprep.subr.bf16.mxu0 %v445_v3 }
 0x282   :  { %v413_v60 = vld [vmem:[#allocation3 + $0x8] ss:$0 sps:$4 sm:$0xff]  }
 0x283   :  { %v265_v61 = vsel %vm263_vm11, %v413_v60, 0 }
 0x284   :  { %396 = vmatpush3.bf16.msra.mxu0 %v265_v61 }
 0x287   :  { %398 = vmatmul.mubr.msk.bf16.vlgmr.msra.gmra.mrb[4].mxu0 %vm259_vm12, %v246_v62 }
 0x2b9   :  { %v205_v63 = vpop.xlane.xlu1 %204 }
 0x2ba   :  { %v206_v0 = vmul.f32 0.0625, %v205_v63 }
 0x2bc   :  { %v212_v2 = vmul.f32 %v206_v0, %v206_v0  ;;  %v214_v13 = vsub.f32 %v532_v29, %v206_v0 }
 0x2bd   :  { %v230_v20 = vpop.permute.xlu1 %229 }
 0x2be   :  { %v213_v5 = vsub.f32 %v211_v4, %v212_v2 }
 0x2c0   :  { %v215_v7 = vadd.f32 1e-05, %v213_v5 }
 0x2c2   :  { %416 = vrsqrt.f32 %v215_v7 }
 0x2cc   :  { %v417_v14 = vpop.eup %416 }
 0x2cd   :  { %v217_v15 = vmul.f32 %v417_v14, %v214_v13 }
 0x2cf   :  { %v224_v19 = vmul.f32 %v222_v17, %v217_v15 }
 0x2d1   :  { %v232_v21 = vadd.f32 %v230_v20, %v224_v19 }
 0x35a   :  { %v301_v6 = vpop.f32.mrb[4].mxu0 }
 0x35b   :  { %v399_v3 = vpop.f32.mrb[5].mxu0  ;;  %v308_v8 = vsel %vm307_vm13, %v301_v6, 0.0  ;;  %v312_v9 = vmul.f32 %v301_v6, %v301_v6 }
 0x35c   :  { %309 = vadd.xlane.f32.xlu0 %v308_v8  ;;  %v304_v10 = vpop.f32.mrb[6].mxu0 }
 0x35d   :  { %v400_v11 = vpop.f32.mrb[7].mxu0  ;;  %v313_v12 = vsel %vm307_vm13, %v312_v9, 0.0 }
 0x35e   :  { %314 = vadd.xlane.f32.xlu1 %v313_v12 }
 0x36f   :  { %334 = vperm.xlu1 %408, %v372_v16  }
 0x372   :  { %326 = vperm.xlu0 %409, %v323_v18  }
 0x376   :  { %339 = vrot.lane.b32.xlu0 %v232_v21, %s444_s26 }
 0x3e9   :  { %v310_v22 = vpop.xlane.xlu0 %309 }
 0x3ea   :  { %v311_v23 = vmul.f32 0.0625, %v310_v22 }
 0x3eb   :  { %v315_v24 = vpop.xlane.xlu1 %314 }
 0x3ec   :  { %v317_v25 = vmul.f32 %v311_v23, %v311_v23  ;;  %v316_v26 = vmul.f32 0.0625, %v315_v24  ;;  %v319_v29 = vsub.f32 %v301_v6, %v311_v23 }
 0x3ee   :  { %v318_v27 = vsub.f32 %v316_v26, %v317_v25 }
 0x3ef   :  { %v335_v34 = vpop.permute.xlu1 %334 }
 0x3f0   :  { %v320_v28 = vadd.f32 1e-05, %v318_v27 }
 0x3f1   :  { %v327_v31 = vpop.permute.xlu0 %326 }
 0x3f2   :  { %418 = vrsqrt.f32 %v320_v28 }
 0x3f5   :  { %v340_v36 = vpop.permute.xlu0 %339 }
 0x3fc   :  { %v419_v30 = vpop.eup %418 }
 0x3fd   :  { %v322_v32 = vmul.f32 %v419_v30, %v319_v29 }
 0x3ff   :  { %v329_v33 = vmul.f32 %v327_v31, %v322_v32 }
 0x401   :  { %v337_v35 = vadd.f32 %v335_v34, %v329_v33 }
 0x403   :  { %v342_v37 = vadd.f32 %v340_v36, %v337_v35 }
 0x405   :  { %v344_v38 = vmul.f32 0.01, %v342_v37  ;;  %vm343_vm14 = vcmp.ge.f32.partialorder %v342_v37, 0.0 }
 0x407   :  { %v345_v39 = vsel %vm343_vm14, %v342_v37, %v344_v38 }
 0x408   :  { %346 = vst.msk [vmem:[#allocation4] sm:$0xff] %vm307_vm13, %v345_v39 }
 0x409   :  { %431 = shalt.err (!%p428_p4)
}
 0x40a   :  { %s432_s25 = scalar_lea.hbm %s582_s7, 128 }
 0x40b   :  { %p433_p5 = scmp.ne.s32.totalorder %s582_s7, %s432_s25  ;;  %p436_p6 = scmp.lt.u32.totalorder %s432_s25, %s582_s7 }
 0x40d   :  { %p438_p7 = pnand %p436_p6, %p433_p5 }
 0x40f   :  { %441 = shalt.err (!%p438_p7)
}
 0x410   :  { %356 = dma.vmem_to_hbm [thread:$0]  %s354_s21, 128, %s582_s7, [#allocation5]  }
 0x411   :  { %442 = dma.done.wait [#allocation5], 128  }
 0x412   :  { %443 = vsyncadd [#allocation5], 4294967168 }
 0x413   :  { %360 = vsyncpa [#allocation5], 1 }

</bundles_post_ra>
